<compile_context>
chip_gen: v7x
topology: tpu7x:2x2x1
jax: 0.10.0
libtpu: 0.0.40
codegen_flags: <defaults>
</compile_context>

<pallas_src>
import jax
import jax.numpy as jnp
from jax.experimental import pallas as pl
from jax.experimental.pallas import tpu as pltpu

_LANE = 128  # f32 lane width


def _round_up(n, m):
    return ((n + m - 1) // m) * m


def _vmem_capacity_bytes():
    """Physical VMEM per core; falls back to 128 MiB if the query is unavailable."""
    try:
        return int(pltpu.get_tpu_info().vmem_capacity_bytes)
    except Exception:
        return 128 * 1024 * 1024


def _discriminator_kernel(x_ref, w1_ref, b1_ref, w2_ref, b2_ref,
                          w3_ref, b3_ref, o_ref):
    # One batch tile per grid step; weights/biases are VMEM-resident.
    # x arrives in f32 (no wrapper cast pass); cast to the MXU operand dtype
    # on the VPU right before the first dot. f32 accumulation everywhere.
    x = x_ref[...].astype(w1_ref.dtype)

    h1 = jnp.dot(x, w1_ref[...],
                 preferred_element_type=jnp.float32) + b1_ref[...]
    h1 = jnp.maximum(h1, 0.0)

    h2 = jnp.dot(h1.astype(w2_ref.dtype), w2_ref[...],
                 preferred_element_type=jnp.float32) + b2_ref[...]
    h2 = jnp.maximum(h2, 0.0)

    z = jnp.dot(h2.astype(w3_ref.dtype), w3_ref[...],
                preferred_element_type=jnp.float32) + b3_ref[...]

    # Narrow writeback: keep only the real output columns (out_size, usually 1)
    # instead of a lane-padded 128-wide f32 stream.
    n_out = o_ref.shape[1]
    o_ref[...] = jax.nn.sigmoid(z[:, :n_out]).astype(o_ref.dtype)


def prepare_params(params, *, matmul_dtype=jnp.bfloat16):
    """Pad + cast the weights ONCE (hoisted out of the per-call forward).

    Weights are stored as (in_features, out_features) — the transpose of
    torch.nn.Linear.weight — so the kernel computes x @ W + b directly.
    Biases stay f32 (f32 epilogue); weights are cast to `matmul_dtype`.
    """
    w1, b1, w2, b2, w3, b3 = (params["w1"], params["b1"], params["w2"],
                              params["b2"], params["w3"], params["b3"])
    in_size, hidden = w1.shape
    out_size = w3.shape[1]

    k_pad = _round_up(in_size, _LANE)
    h_pad = _round_up(hidden, _LANE)
    o_pad = _round_up(out_size, _LANE)

    def pad_w(a, rows, cols):
        a = jnp.asarray(a)
        a = jnp.pad(a, ((0, rows - a.shape[0]), (0, cols - a.shape[1])))
        return a.astype(matmul_dtype)

    def pad_b(a, cols):
        a = jnp.asarray(a).reshape(1, -1)
        a = jnp.pad(a, ((0, 0), (0, cols - a.shape[1])))
        return a.astype(jnp.float32)

    return {
        "_prepared": True,
        "matmul_dtype": jnp.dtype(matmul_dtype),
        "in_size": int(in_size), "hidden": int(hidden), "out_size": int(out_size),
        "k_pad": k_pad, "h_pad": h_pad, "o_pad": o_pad,
        "w1": pad_w(w1, k_pad, h_pad), "b1": pad_b(b1, h_pad),
        "w2": pad_w(w2, h_pad, h_pad), "b2": pad_b(b2, h_pad),
        "w3": pad_w(w3, h_pad, o_pad), "b3": pad_b(b3, o_pad),
    }


def discriminator_forward(x, params, *, block_b=None, matmul_dtype=jnp.bfloat16):
    """x: (B, input_size) f32. params: raw dict (auto-prepared) or prepare_params output."""
    if not params.get("_prepared", False):
        params = prepare_params(params, matmul_dtype=matmul_dtype)

    B, in_size = x.shape
    assert in_size == params["in_size"], "input feature size mismatch"
    k_pad = params["k_pad"]
    h_pad = params["h_pad"]
    o_pad = params["o_pad"]
    out_size = params["out_size"]
    mm_dtype = params["matmul_dtype"]

    # ---- batch tile (dtype- and generation-aware) ------------------------
    if block_b is None:
        # 128 MiB VMEM parts (v5e/v6e) reach HBM roofline around 512-row
        # tiles; v7x has 64 MiB and faster HBM, so keep the tile smaller.
        block_b = 512 if _vmem_capacity_bytes() >= (96 << 20) else 256
    granule = max(8, 32 // jnp.dtype(mm_dtype).itemsize)   # f32:8  bf16:16  i8/fp8:32
    tb = _round_up(min(block_b, _round_up(B, granule)), granule)
    b_pad = _round_up(B, tb)
    grid = (b_pad // tb,)

    # x stays f32 and is padded only if B / in_size are not already aligned;
    # the bf16 cast happens inside the kernel (halves wrapper-side x traffic).
    if x.shape != (b_pad, k_pad):
        x = jnp.pad(x, ((0, b_pad - B), (0, k_pad - in_size)))
    x = x.astype(jnp.float32)

    w1, b1, w2, b2, w3, b3 = (params["w1"], params["b1"], params["w2"],
                              params["b2"], params["w3"], params["b3"])

    # ---- BlockSpecs -------------------------------------------------------
    x_spec = pl.BlockSpec((tb, k_pad), lambda i: (i, 0))
    out_spec = pl.BlockSpec((tb, out_size), lambda i: (i, 0))   # narrow, full last dim
    resident = lambda a: pl.BlockSpec(a.shape, lambda i: (0, 0))

    # ---- explicit VMEM budget --------------------------------------------
    def nbytes(a):
        return int(a.size) * jnp.dtype(a.dtype).itemsize
    resident_bytes = 2 * sum(nbytes(a) for a in (w1, b1, w2, b2, w3, b3))  # 2x buffers
    tile_bytes = 2 * (tb * k_pad * 4 + tb * out_size * 4)                   # x/out pipeline
    interm_bytes = 4 * tb * h_pad * 4                                       # h1/h2 (+casts)
    cap = _vmem_capacity_bytes()
    vmem_limit = int(min(max(resident_bytes + tile_bytes + interm_bytes + (8 << 20),
                             32 << 20),
                         int(0.75 * cap), 100 << 20))

    # ---- cost estimate (lets XLA overlap this call with neighbors) -------
    cost = pl.CostEstimate(
        flops=2 * b_pad * (k_pad * h_pad + h_pad * h_pad + h_pad * o_pad),
        transcendentals=b_pad * out_size,
        bytes_accessed=(b_pad * k_pad * 4 + b_pad * out_size * 4
                        + sum(nbytes(a) for a in (w1, b1, w2, b2, w3, b3))),
    )

    out = pl.pallas_call(
        _discriminator_kernel,
        out_shape=jax.ShapeDtypeStruct((b_pad, out_size), jnp.float32),
        grid=grid,
        in_specs=[x_spec, resident(w1), resident(b1), resident(w2),
                  resident(b2), resident(w3), resident(b3)],
        out_specs=out_spec,
        compiler_params=pltpu.CompilerParams(
            dimension_semantics=("parallel",),
            vmem_limit_bytes=vmem_limit),
        cost_estimate=cost,
    )(x, w1, b1, w2, b2, w3, b3)

    return out if b_pad == B else out[:B]


def init_params(key, input_size, hidden_size, output_size):
    """Deterministic PyTorch-style (uniform +/- 1/sqrt(fan_in)) init."""
    ks = jax.random.split(key, 6)

    def lin(kw, kb, fan_in, fan_out):
        bound = 1.0 / jnp.sqrt(fan_in)
        # stored as (in, out) == transpose of torch.nn.Linear.weight
        w = jax.random.uniform(kw, (fan_in, fan_out), jnp.float32, -bound, bound)
        b = jax.random.uniform(kb, (1, fan_out), jnp.float32, -bound, bound)
        return w, b

    w1, b1 = lin(ks[0], ks[1], input_size, hidden_size)
    w2, b2 = lin(ks[2], ks[3], hidden_size, hidden_size)
    w3, b3 = lin(ks[4], ks[5], hidden_size, output_size)
    return {"w1": w1, "b1": b1, "w2": w2, "b2": b2, "w3": w3, "b3": b3}


def _reference_forward(x, p):
    h1 = jnp.maximum(x @ p["w1"] + p["b1"], 0.0)
    h2 = jnp.maximum(h1 @ p["w2"] + p["b2"], 0.0)
    return jax.nn.sigmoid(h2 @ p["w3"] + p["b3"])


if __name__ == "__main__":
    # Small shapes consistent with the module's forward.
    batch, input_size, hidden_size, output_size = 8, 4, 32, 1

    key = jax.random.PRNGKey(0)
    k_x, k_p = jax.random.split(key)
    x = jax.random.normal(k_x, (batch, input_size), jnp.float32)
    params = init_params(k_p, input_size, hidden_size, output_size)

    ref = _reference_forward(x, params)

    # Exact-precision path (f32 MXU operands) — tight check.
    prep_f32 = prepare_params(params, matmul_dtype=jnp.float32)
    out_f32 = jax.block_until_ready(discriminator_forward(x, prep_f32))
    assert out_f32.shape == (batch, output_size)
    assert jnp.allclose(out_f32, ref, atol=1e-5, rtol=1e-5)

    # Default fast path (bf16 MXU operands, f32 accumulation + epilogue).
    prep_bf16 = prepare_params(params)                 # pad/cast runs once here...
    out_bf16 = jax.block_until_ready(discriminator_forward(x, prep_bf16))
    out_bf16 = jax.block_until_ready(discriminator_forward(x, prep_bf16))  # ...not per call
    assert out_bf16.shape == (batch, output_size)
    assert jnp.allclose(out_bf16, ref, atol=2e-2, rtol=2e-2)

    print("KERNEL_OK")
</pallas_src>

<mosaic_0001>
module attributes {stable_mosaic.version = 11 : i64} {
  func.func @_discriminator_kernel(%arg0: i32, %arg1: memref<8x128xf32, #tpu.memory_space<vmem>>, %arg2: memref<128x128xf32, #tpu.memory_space<vmem>>, %arg3: memref<1x128xf32, #tpu.memory_space<vmem>>, %arg4: memref<128x128xf32, #tpu.memory_space<vmem>>, %arg5: memref<1x128xf32, #tpu.memory_space<vmem>>, %arg6: memref<128x128xf32, #tpu.memory_space<vmem>>, %arg7: memref<1x128xf32, #tpu.memory_space<vmem>>, %arg8: memref<8x1xf32, #tpu.memory_space<vmem>>) attributes {dimension_semantics = [#tpu.dimension_semantics<parallel>], iteration_bounds = array<i64: 1>, scalar_prefetch = 0 : i64, scratch_operands = 0 : i64, tpu.core_type = #tpu.core_type<tc>, window_params = [{transform_indices = @transform_0, window_bounds = array<i64: 8, 128>}, {pipeline_mode = #tpu.pipeline_mode<synchronous>, transform_indices = @transform_1, window_bounds = array<i64: 128, 128>}, {pipeline_mode = #tpu.pipeline_mode<synchronous>, transform_indices = @transform_2, window_bounds = array<i64: 1, 128>}, {pipeline_mode = #tpu.pipeline_mode<synchronous>, transform_indices = @transform_3, window_bounds = array<i64: 128, 128>}, {pipeline_mode = #tpu.pipeline_mode<synchronous>, transform_indices = @transform_4, window_bounds = array<i64: 1, 128>}, {pipeline_mode = #tpu.pipeline_mode<synchronous>, transform_indices = @transform_5, window_bounds = array<i64: 128, 128>}, {pipeline_mode = #tpu.pipeline_mode<synchronous>, transform_indices = @transform_6, window_bounds = array<i64: 1, 128>}, {transform_indices = @transform_7, window_bounds = array<i64: 8, 1>}]} {
    %c0 = arith.constant 0 : index
    %c0_0 = arith.constant 0 : index
    %0 = vector.load %arg1[%c0, %c0_0] : memref<8x128xf32, #tpu.memory_space<vmem>>, vector<8x128xf32>
    %c0_1 = arith.constant 0 : index
    %c0_2 = arith.constant 0 : index
    %1 = vector.load %arg2[%c0_1, %c0_2] : memref<128x128xf32, #tpu.memory_space<vmem>>, vector<128x128xf32>
    %cst = arith.constant dense<0.000000e+00> : vector<8x128xf32>
    %2 = tpu.matmul %0, %1, %cst {dimension_numbers = #tpu.dot_dimension_numbers<[1], [0], [0], [1], [0, 0, 1, 1], [], []>} : vector<8x128xf32>, vector<128x128xf32>, vector<8x128xf32> -> vector<8x128xf32>
    %c0_3 = arith.constant 0 : index
    %c0_4 = arith.constant 0 : index
    %3 = vector.load %arg3[%c0_3, %c0_4] : memref<1x128xf32, #tpu.memory_space<vmem>>, vector<1x128xf32>
    %4 = vector.broadcast %3 : vector<1x128xf32> to vector<8x128xf32>
    %5 = arith.addf %2, %4 : vector<8x128xf32>
    %cst_5 = arith.constant 0.000000e+00 : f32
    %6 = vector.broadcast %cst_5 : f32 to vector<8x128xf32>
    %7 = arith.maximumf %5, %6 : vector<8x128xf32>
    %c0_6 = arith.constant 0 : index
    %c0_7 = arith.constant 0 : index
    %8 = vector.load %arg4[%c0_6, %c0_7] : memref<128x128xf32, #tpu.memory_space<vmem>>, vector<128x128xf32>
    %cst_8 = arith.constant dense<0.000000e+00> : vector<8x128xf32>
    %9 = tpu.matmul %7, %8, %cst_8 {dimension_numbers = #tpu.dot_dimension_numbers<[1], [0], [0], [1], [0, 0, 1, 1], [], []>} : vector<8x128xf32>, vector<128x128xf32>, vector<8x128xf32> -> vector<8x128xf32>
    %c0_9 = arith.constant 0 : index
    %c0_10 = arith.constant 0 : index
    %10 = vector.load %arg5[%c0_9, %c0_10] : memref<1x128xf32, #tpu.memory_space<vmem>>, vector<1x128xf32>
    %11 = vector.broadcast %10 : vector<1x128xf32> to vector<8x128xf32>
    %12 = arith.addf %9, %11 : vector<8x128xf32>
    %cst_11 = arith.constant 0.000000e+00 : f32
    %13 = vector.broadcast %cst_11 : f32 to vector<8x128xf32>
    %14 = arith.maximumf %12, %13 : vector<8x128xf32>
    %c0_12 = arith.constant 0 : index
    %c0_13 = arith.constant 0 : index
    %15 = vector.load %arg6[%c0_12, %c0_13] : memref<128x128xf32, #tpu.memory_space<vmem>>, vector<128x128xf32>
    %cst_14 = arith.constant dense<0.000000e+00> : vector<8x128xf32>
    %16 = tpu.matmul %14, %15, %cst_14 {dimension_numbers = #tpu.dot_dimension_numbers<[1], [0], [0], [1], [0, 0, 1, 1], [], []>} : vector<8x128xf32>, vector<128x128xf32>, vector<8x128xf32> -> vector<8x128xf32>
    %c0_15 = arith.constant 0 : index
    %c0_16 = arith.constant 0 : index
    %17 = vector.load %arg7[%c0_15, %c0_16] : memref<1x128xf32, #tpu.memory_space<vmem>>, vector<1x128xf32>
    %18 = vector.broadcast %17 : vector<1x128xf32> to vector<8x128xf32>
    %19 = arith.addf %16, %18 : vector<8x128xf32>
    %20 = vector.extract_strided_slice %19 {offsets = [0, 0], sizes = [8, 1], strides = [1, 1]} : vector<8x128xf32> to vector<8x1xf32>
    %21 = arith.negf %20 : vector<8x1xf32>
    %22 = math.exp %21 : vector<8x1xf32>
    %cst_17 = arith.constant 1.000000e+00 : f32
    %23 = vector.broadcast %cst_17 : f32 to vector<8x1xf32>
    %24 = arith.addf %23, %22 : vector<8x1xf32>
    %25 = arith.divf %23, %24 : vector<8x1xf32>
    %c0_18 = arith.constant 0 : index
    %c0_19 = arith.constant 0 : index
    %26 = vector.load %arg8[%c0_18, %c0_19] : memref<8x1xf32, #tpu.memory_space<vmem>>, vector<8x1xf32>
    tpu.vector_store %arg8[%c0_18, %c0_19], %25 {strides = array<i32>} : memref<8x1xf32, #tpu.memory_space<vmem>>, vector<8x1xf32>,
    return
  }
  func.func @transform_0(%arg0: i32) -> (i32, i32) {
    %c0_i32 = arith.constant 0 : i32
    %c0_i32_0 = arith.constant 0 : i32
    return %arg0, %c0_i32 : i32, i32
  }
  func.func @transform_1(%arg0: i32) -> (i32, i32) {
    %c0_i32 = arith.constant 0 : i32
    %c0_i32_0 = arith.constant 0 : i32
    %c0_i32_1 = arith.constant 0 : i32
    return %c0_i32, %c0_i32_0 : i32, i32
  }
  func.func @transform_2(%arg0: i32) -> (i32, i32) {
    %c0_i32 = arith.constant 0 : i32
    %c0_i32_0 = arith.constant 0 : i32
    %c0_i32_1 = arith.constant 0 : i32
    return %c0_i32, %c0_i32_0 : i32, i32
  }
  func.func @transform_3(%arg0: i32) -> (i32, i32) {
    %c0_i32 = arith.constant 0 : i32
    %c0_i32_0 = arith.constant 0 : i32
    %c0_i32_1 = arith.constant 0 : i32
    return %c0_i32, %c0_i32_0 : i32, i32
  }
  func.func @transform_4(%arg0: i32) -> (i32, i32) {
    %c0_i32 = arith.constant 0 : i32
    %c0_i32_0 = arith.constant 0 : i32
    %c0_i32_1 = arith.constant 0 : i32
    return %c0_i32, %c0_i32_0 : i32, i32
  }
  func.func @transform_5(%arg0: i32) -> (i32, i32) {
    %c0_i32 = arith.constant 0 : i32
    %c0_i32_0 = arith.constant 0 : i32
    %c0_i32_1 = arith.constant 0 : i32
    return %c0_i32, %c0_i32_0 : i32, i32
  }
  func.func @transform_6(%arg0: i32) -> (i32, i32) {
    %c0_i32 = arith.constant 0 : i32
    %c0_i32_0 = arith.constant 0 : i32
    %c0_i32_1 = arith.constant 0 : i32
    return %c0_i32, %c0_i32_0 : i32, i32
  }
  func.func @transform_7(%arg0: i32) -> (i32, i32) {
    %c0_i32 = arith.constant 0 : i32
    %c0_i32_0 = arith.constant 0 : i32
    return %arg0, %c0_i32 : i32, i32
  }
}

</mosaic_0001>

<bundles_post_ra>
// kernel: tpu_custom_call.1
= control target key start
LH: loop header
LB: loop body
LE: loop exit
PB: predicated region body
PF: predicated region fallthrough
CT: control target
= control target key end

     0   :  { %12 = vsyncpa [#allocation3], 0  ;;  %s863_s0 = inlined_call_operand.hbm [shape: f32[8,128], index: 0, kind: input, shape index: {}]   ;;  %s864_s1 = inlined_call_operand.hbm [shape: f32[128,128], index: 1, kind: input, shape index: {}]   ;;  %s865_s2 = inlined_call_operand.vmem [shape: f32[1,128], index: 2, kind: input, shape index: {}]   ;;  %s866_s3 = inlined_call_operand.hbm [shape: f32[128,128], index: 3, kind: input, shape index: {}]   ;;  %s867_s4 = inlined_call_operand.vmem [shape: f32[1,128], index: 4, kind: input, shape index: {}]   ;;  %s868_s5 = inlined_call_operand.hbm [shape: f32[128,128], index: 5, kind: input, shape index: {}]   ;;  %s869_s6 = inlined_call_operand.vmem [shape: f32[1,128], index: 6, kind: input, shape index: {}]   ;;  %s870_s7 = inlined_call_operand.vmem [shape: f32[8,1], index: 7, kind: output, shape index: {}]  }
   0x1   :  { %13 = vsyncpa [#allocation5], 0 }
   0x2   :  { %14 = vsyncpa [#allocation8], 0  ;;  %s715_s24 = smov [#allocation4]   ;;  %s621_s28 = scalar_lea.hbm %s864_s1, 2048 }
   0x3   :  { %s30_s25 = sshll.u32 %s715_s24, 4  ;;  %p622_p0 = scmp.ne.s32.totalorder %s864_s1, %s621_s28  ;;  %s31_s25 = int_to_ptr.vmem [resolvable:$true] %s30_s25 }
   0x4   :  { %p625_p1 = scmp.lt.u32.totalorder %s621_s28, %s864_s1 }
   0x6   :  { %p627_p2 = pnand %p625_p1, %p622_p0 }
   0x8   :  { %630 = shalt.err (!%p627_p2)
}
   0x9   :  { %s631_s10 = scalar_lea.vmem %s31_s25, 2048  ;;  %p636_p4 = scmp.lt.s32.totalorder %s31_s25, %s31_s25 }
   0xa   :  { %p632_p3 = scmp.ne.s32.totalorder %s31_s25, %s631_s10  ;;  %p637_p5 = scmp.lt.s32.totalorder %s631_s10, %s631_s10 }
   0xc   :  { %p638_p6 = por %p637_p5, %p636_p4 }
   0xe   :  { %p639_p7 = pnand %p638_p6, %p632_p3 }
  0x10   :  { %642 = shalt.err (!%p639_p7)
}
  0x11   :  { %s716_s11 = smov 128   ;;  %s717_s12 = smov 8  }
  0x12   :  { %36 = dma.hbm_to_vmem [thread:$0]  %s864_s1, 2048, %s31_s25, [#allocation5], %s716_s11, %s716_s11, %s717_s12  }
  0x13   :  { %s718_s15 = smov [#allocation2]   ;;  %s719_s17 = smov [#allocation6]  }
  0x14   :  { %s21_s16 = sshll.u32 %s718_s15, 4  ;;  %s44_s18 = sshll.u32 %s719_s17, 4  ;;  %s22_s16 = int_to_ptr.vmem [resolvable:$true] %s21_s16  ;;  %s45_s18 = int_to_ptr.vmem [resolvable:$true] %s44_s18 }
  0x15   :  { %s643_s21 = scalar_lea.hbm %s863_s0, 128 }
  0x16   :  { %p644_p8 = scmp.ne.s32.totalorder %s863_s0, %s643_s21  ;;  %p647_p9 = scmp.lt.u32.totalorder %s643_s21, %s863_s0 }
  0x18   :  { %p649_p10 = pnand %p647_p9, %p644_p8 }
  0x1a   :  { %652 = shalt.err (!%p649_p10)
}
  0x1b   :  { %s653_s1 = scalar_lea.vmem %s22_s16, 128  ;;  %p658_p12 = scmp.lt.s32.totalorder %s22_s16, %s22_s16 }
  0x1c   :  { %p654_p11 = scmp.ne.s32.totalorder %s22_s16, %s653_s1  ;;  %p659_p13 = scmp.lt.s32.totalorder %s653_s1, %s653_s1 }
  0x1e   :  { %p660_p0 = por %p659_p13, %p658_p12 }
  0x20   :  { %p661_p1 = pnand %p660_p0, %p654_p11 }
  0x22   :  { %664 = shalt.err (!%p661_p1)
}
  0x23   :  { %24 = dma.hbm_to_vmem [thread:$0]  %s863_s0, 128, %s22_s16, [#allocation3]  }
  0x24   :  { %s665_s30 = scalar_lea.hbm %s866_s3, 2048 }
  0x25   :  { %p666_p2 = scmp.ne.s32.totalorder %s866_s3, %s665_s30  ;;  %p669_p3 = scmp.lt.u32.totalorder %s665_s30, %s866_s3 }
  0x27   :  { %p671_p4 = pnand %p669_p3, %p666_p2 }
  0x29   :  { %674 = shalt.err (!%p671_p4)
}
  0x2a   :  { %s675_s14 = scalar_lea.vmem %s45_s18, 2048  ;;  %p680_p6 = scmp.lt.s32.totalorder %s45_s18, %s45_s18 }
  0x2b   :  { %p676_p5 = scmp.ne.s32.totalorder %s45_s18, %s675_s14  ;;  %p681_p7 = scmp.lt.s32.totalorder %s675_s14, %s675_s14 }
  0x2d   :  { %p682_p8 = por %p681_p7, %p680_p6 }
  0x2f   :  { %p683_p9 = pnand %p682_p8, %p676_p5 }
  0x31   :  { %686 = shalt.err (!%p683_p9)
}
  0x32   :  { %50 = dma.hbm_to_vmem [thread:$0]  %s866_s3, 2048, %s45_s18, [#allocation5], %s716_s11, %s716_s11, %s717_s12  }
  0x33   :  { %s720_s16 = smov [#allocation7]   ;;  %s687_s21 = scalar_lea.hbm %s868_s5, 2048 }
  0x34   :  { %s58_s17 = sshll.u32 %s720_s16, 4  ;;  %p688_p10 = scmp.ne.s32.totalorder %s868_s5, %s687_s21  ;;  %s59_s17 = int_to_ptr.vmem [resolvable:$true] %s58_s17 }
  0x35   :  { %p691_p11 = scmp.lt.u32.totalorder %s687_s21, %s868_s5 }
  0x37   :  { %p693_p12 = pnand %p691_p11, %p688_p10 }
  0x39   :  { %696 = shalt.err (!%p693_p12)
}
  0x3a   :  { %s697_s1 = scalar_lea.vmem %s59_s17, 2048  ;;  %p702_p0 = scmp.lt.s32.totalorder %s59_s17, %s59_s17 }
  0x3b   :  { %p698_p13 = scmp.ne.s32.totalorder %s59_s17, %s697_s1  ;;  %p703_p1 = scmp.lt.s32.totalorder %s697_s1, %s697_s1 }
  0x3d   :  { %p704_p2 = por %p703_p1, %p702_p0 }
  0x3f   :  { %p705_p3 = pnand %p704_p2, %p698_p13 }
  0x41   :  { %708 = shalt.err (!%p705_p3)
}
  0x42   :  { %64 = dma.hbm_to_vmem [thread:$0]  %s868_s5, 2048, %s59_s17, [#allocation8], %s716_s11, %s716_s11, %s717_s12  }
  0x43   :  { %709 = dma.done.wait [#allocation3], 128  }
  0x44   :  { %710 = vsyncadd [#allocation3], 4294967168 }
  0x45   :  { %711 = dma.done.wait [#allocation5], 4096  }
  0x46   :  { %712 = vsyncadd [#allocation5], 4294963200 }
  0x47   :  { %713 = dma.done.wait [#allocation8], 2048  }
  0x48   :  { %714 = vsyncadd [#allocation8], 4294965248  ;;  %v721_v0 = vmov 0.0|0.0   ;;  %vm722_vm0 = vmmov 0   ;;  %v723_v1 = vmov 0.0   ;;  %v80_v2 = vld [vmem:[#allocation4] sm:$0xff] }
  0x49   :  { %536 = vmatprep.subr.bf16.mxu0 %v721_v0  ;;  %463 = vmatprep.mubr.msk.f32.mxu0 %vm722_vm0, %v723_v1  ;;  %v81_v3 = vld [vmem:[#allocation4 + $0x8] sm:$0xff]  ;;  %v82_v4 = vld [vmem:[#allocation4 + $0x10] sm:$0xff]  ;;  %v83_v6 = vld [vmem:[#allocation4 + $0x18] sm:$0xff]  ;;  %vm367_vm1 = vcmask 7168  }
  0x4a   :  { %560 = vmatprep.subr.bf16.mxu1 %v721_v0  ;;  %498 = vmatprep.mubr.msk.f32.mxu1 %vm722_vm0, %v723_v1  ;;  %v537_v5 = vpack.c.bf16 %v81_v3, %v80_v2  ;;  %v540_v7 = vpack.c.bf16 %v83_v6, %v82_v4  ;;  %v84_v8 = vld [vmem:[#allocation4 + $0x20] sm:$0xff]  ;;  %v85_v9 = vld [vmem:[#allocation4 + $0x28] sm:$0xff]  ;;  %v176_v12 = vld [vmem:[#allocation6 + $0x10] sm:$0xff] }
  0x4b   :  { %v174_v10 = vld [vmem:[#allocation6] sm:$0xff]  ;;  %v175_v11 = vld [vmem:[#allocation6 + $0x8] sm:$0xff]  ;;  %v177_v13 = vld [vmem:[#allocation6 + $0x18] sm:$0xff]  ;;  %v543_v14 = vpack.c.bf16 %v85_v9, %v84_v8 }
  0x4c   :  { %538 = vmatpush3.bf16.msra.mxu0 %v537_v5  ;;  %v561_v15 = vpack.c.bf16 %v175_v11, %v174_v10  ;;  %v86_v16 = vld [vmem:[#allocation4 + $0x30] sm:$0xff]  ;;  %v87_v17 = vld [vmem:[#allocation4 + $0x38] sm:$0xff]  ;;  %v564_v18 = vpack.c.bf16 %v177_v13, %v176_v12  ;;  %v178_v19 = vld [vmem:[#allocation6 + $0x20] sm:$0xff] }
  0x4d   :  { %539 = vmatprep.subr.bf16.mxu0 %v721_v0  ;;  %v179_v20 = vld [vmem:[#allocation6 + $0x28] sm:$0xff]  ;;  %v546_v21 = vpack.c.bf16 %v87_v17, %v86_v16  ;;  %v88_v22 = vld [vmem:[#allocation4 + $0x40] sm:$0xff]  ;;  %v180_v25 = vld [vmem:[#allocation6 + $0x30] sm:$0xff] }
  0x4e   :  { %562 = vmatpush3.bf16.msra.mxu1 %v561_v15  ;;  %v89_v23 = vld [vmem:[#allocation4 + $0x48] sm:$0xff]  ;;  %v567_v24 = vpack.c.bf16 %v179_v20, %v178_v19  ;;  %v181_v26 = vld [vmem:[#allocation6 + $0x38] sm:$0xff]  ;;  %v90_v28 = vld [vmem:[#allocation4 + $0x50] sm:$0xff] }
  0x4f   :  { %563 = vmatprep.subr.bf16.mxu1 %v721_v0  ;;  %v549_v27 = vpack.c.bf16 %v89_v23, %v88_v22  ;;  %v91_v29 = vld [vmem:[#allocation4 + $0x58] sm:$0xff]  ;;  %v570_v30 = vpack.c.bf16 %v181_v26, %v180_v25  ;;  %v182_v31 = vld [vmem:[#allocation6 + $0x40] sm:$0xff]  ;;  %v183_v32 = vld [vmem:[#allocation6 + $0x48] sm:$0xff] }
  0x50   :  { %541 = vmatpush3.bf16.msra.mxu0 %v540_v7  ;;  %v552_v33 = vpack.c.bf16 %v91_v29, %v90_v28  ;;  %v92_v34 = vld [vmem:[#allocation4 + $0x60] sm:$0xff]  ;;  %v93_v35 = vld [vmem:[#allocation4 + $0x68] sm:$0xff]  ;;  %v573_v36 = vpack.c.bf16 %v183_v32, %v182_v31  ;;  %v184_v37 = vld [vmem:[#allocation6 + $0x50] sm:$0xff] }
  0x51   :  { %542 = vmatprep.subr.bf16.mxu0 %v721_v0  ;;  %v185_v38 = vld [vmem:[#allocation6 + $0x58] sm:$0xff]  ;;  %v555_v39 = vpack.c.bf16 %v93_v35, %v92_v34  ;;  %v94_v40 = vld [vmem:[#allocation4 + $0x70] sm:$0xff]  ;;  %v186_v43 = vld [vmem:[#allocation6 + $0x60] sm:$0xff] }
  0x52   :  { %565 = vmatpush3.bf16.msra.mxu1 %v564_v18  ;;  %v95_v41 = vld [vmem:[#allocation4 + $0x78] sm:$0xff]  ;;  %v576_v42 = vpack.c.bf16 %v185_v38, %v184_v37  ;;  %v187_v44 = vld [vmem:[#allocation6 + $0x68] sm:$0xff]  ;;  %v188_v48 = vld [vmem:[#allocation6 + $0x70] sm:$0xff] }
  0x53   :  { %566 = vmatprep.subr.bf16.mxu1 %v721_v0  ;;  %v558_v45 = vpack.c.bf16 %v95_v41, %v94_v40  ;;  %v579_v46 = vpack.c.bf16 %v187_v44, %v186_v43  ;;  %v79_v47 = vld [vmem:[#allocation2] sm:$0xff]  ;;  %v268_v51 = vld [vmem:[#allocation7] sm:$0xff]  ;;  %v269_v52 = vld [vmem:[#allocation7 + $0x8] sm:$0xff] }
  0x54   :  { %544 = vmatpush3.bf16.msra.mxu0 %v543_v14  ;;  %v189_v49 = vld [vmem:[#allocation6 + $0x78] sm:$0xff]  ;;  %v270_v53 = vld [vmem:[#allocation7 + $0x10] sm:$0xff]  ;;  %v585_v54 = vpack.c.bf16 %v269_v52, %v268_v51  ;;  %v272_v57 = vld [vmem:[#allocation7 + $0x20] sm:$0xff] }
  0x55   :  { %545 = vmatprep.subr.bf16.mxu0 %v721_v0  ;;  %v582_v50 = vpack.c.bf16 %v189_v49, %v188_v48  ;;  %v271_v55 = vld [vmem:[#allocation7 + $0x18] sm:$0xff]  ;;  %v273_v58 = vld [vmem:[#allocation7 + $0x28] sm:$0xff]  ;;  %v274_v60 = vld [vmem:[#allocation7 + $0x30] sm:$0xff] }
  0x56   :  { %568 = vmatpush3.bf16.msra.mxu1 %v567_v24  ;;  %v588_v56 = vpack.c.bf16 %v271_v55, %v270_v53  ;;  %v591_v59 = vpack.c.bf16 %v273_v58, %v272_v57  ;;  %v275_v61 = vld [vmem:[#allocation7 + $0x38] sm:$0xff]  ;;  %v276_v63 = vld [vmem:[#allocation7 + $0x40] sm:$0xff]  ;;  %v278_v3 = vld [vmem:[#allocation7 + $0x50] sm:$0xff] }
  0x57   :  { %569 = vmatprep.subr.bf16.mxu1 %v721_v0  ;;  %v594_v62 = vpack.c.bf16 %v275_v61, %v274_v60  ;;  %v279_v4 = vld [vmem:[#allocation7 + $0x58] sm:$0xff]  ;;  %v280_v6 = vld [vmem:[#allocation7 + $0x60] sm:$0xff]  ;;  %v281_v7 = vld [vmem:[#allocation7 + $0x68] sm:$0xff] }
  0x58   :  { %547 = vmatpush3.bf16.msra.mxu0 %v546_v21  ;;  %v600_v5 = vpack.c.bf16 %v279_v4, %v278_v3  ;;  %v603_v8 = vpack.c.bf16 %v281_v7, %v280_v6  ;;  %v376_v9 = vld [vmem:[%s865_s2] ss:$0 sm:$0xff]  ;;  %v282_v14 = vld [vmem:[#allocation7 + $0x70] sm:$0xff] }
  0x59   :  { %548 = vmatprep.subr.bf16.mxu0 %v721_v0  ;;  %v283_v15 = vld [vmem:[#allocation7 + $0x78] sm:$0xff] }
  0x5a   :  { %571 = vmatpush3.bf16.msra.mxu1 %v570_v30  ;;  %v606_v16 = vpack.c.bf16 %v283_v15, %v282_v14  ;;  %v377_v17 = vld [vmem:[%s867_s4] ss:$0 sm:$0xff] }
  0x5b   :  { %572 = vmatprep.subr.bf16.mxu1 %v721_v0  ;;  %v378_v21 = vld [vmem:[%s869_s6] ss:$0 sm:$0xff] }
  0x5c   :  { %550 = vmatpush3.bf16.msra.mxu0 %v549_v27 }
  0x5d   :  { %551 = vmatprep.subr.bf16.mxu0 %v721_v0 }
  0x5e   :  { %574 = vmatpush3.bf16.msra.mxu1 %v573_v36 }
  0x5f   :  { %575 = vmatprep.subr.bf16.mxu1 %v721_v0 }
  0x60   :  { %553 = vmatpush3.bf16.msra.mxu0 %v552_v33 }
  0x61   :  { %554 = vmatprep.subr.bf16.mxu0 %v721_v0 }
  0x62   :  { %577 = vmatpush3.bf16.msra.mxu1 %v576_v42 }
  0x63   :  { %578 = vmatprep.subr.bf16.mxu1 %v721_v0 }
  0x64   :  { %556 = vmatpush3.bf16.msra.mxu0 %v555_v39 }
  0x65   :  { %557 = vmatprep.subr.bf16.mxu0 %v721_v0 }
  0x66   :  { %580 = vmatpush3.bf16.msra.mxu1 %v579_v46 }
  0x67   :  { %581 = vmatprep.subr.bf16.mxu1 %v721_v0 }
  0x68   :  { %559 = vmatpush3.bf16.msra.mxu0 %v558_v45 }
  0x69   :  { %584 = vmatprep.subr.bf16.mxu0 %v721_v0 }
  0x6a   :  { %583 = vmatpush3.bf16.msra.mxu1 %v582_v50 }
  0x6b   :  { %464 = vmatmul.mubr.f32.vlgmr.msra.gmra.mrb[0].mxu0 %v79_v47 }
  0x6c   :  { %533 = vmatprep.mubr.msk.f32.mxu0 %vm722_vm0, %v723_v1  ;;  %586 = vmatpush3.bf16.msra.mxu0 %v585_v54  ;;  %v277_v1 = vld [vmem:[#allocation7 + $0x48] sm:$0xff] }
  0x6d   :  { %587 = vmatprep.subr.bf16.mxu0 %v721_v0  ;;  %v597_v2 = vpack.c.bf16 %v277_v1, %v276_v63 }
  0x70   :  { %589 = vmatpush3.bf16.msra.mxu0 %v588_v56 }
  0x71   :  { %590 = vmatprep.subr.bf16.mxu0 %v721_v0 }
  0x74   :  { %592 = vmatpush3.bf16.msra.mxu0 %v591_v59 }
  0x75   :  { %593 = vmatprep.subr.bf16.mxu0 %v721_v0 }
  0x78   :  { %595 = vmatpush3.bf16.msra.mxu0 %v594_v62 }
  0x79   :  { %596 = vmatprep.subr.bf16.mxu0 %v721_v0 }
  0x7c   :  { %598 = vmatpush3.bf16.msra.mxu0 %v597_v2 }
  0x7d   :  { %599 = vmatprep.subr.bf16.mxu0 %v721_v0 }
  0x80   :  { %601 = vmatpush3.bf16.msra.mxu0 %v600_v5 }
  0x81   :  { %602 = vmatprep.subr.bf16.mxu0 %v721_v0 }
  0x84   :  { %604 = vmatpush3.bf16.msra.mxu0 %v603_v8 }
  0x85   :  { %605 = vmatprep.subr.bf16.mxu0 %v721_v0 }
  0x88   :  { %607 = vmatpush3.bf16.msra.mxu0 %v606_v16 }
 0x13e   :  { %v169_v10 = vpop.f32.mrb[0].mxu0 }
 0x13f   :  { %v170_v11 = vadd.f32 %v376_v9, %v169_v10  ;;  %v465_v12 = vpop.f32.mrb[1].mxu0 }
 0x141   :  { %v173_v13 = vmax.f32 %v170_v11, 0.0 }
 0x143   :  { %499 = vmatmul.mubr.f32.vlgmr.msra.gmra.mrb[0].mxu1 %v173_v13 }
 0x216   :  { %v263_v18 = vpop.f32.mrb[0].mxu1 }
 0x217   :  { %v264_v19 = vadd.f32 %v377_v17, %v263_v18  ;;  %v500_v0 = vpop.f32.mrb[1].mxu1 }
 0x219   :  { %v267_v20 = vmax.f32 %v264_v19, 0.0 }
 0x21b   :  { %534 = vmatmul.mubr.f32.vlgmr.msra.gmra.mrb[2].mxu0 %v267_v20 }
 0x2ee   :  { %v357_v22 = vpop.f32.mrb[2].mxu0 }
 0x2ef   :  { %v358_v23 = vadd.f32 %v378_v21, %v357_v22  ;;  %v535_v24 = vpop.f32.mrb[3].mxu0 }
 0x2f1   :  { %v379_v25 = vmul.f32 -1.442695, %v358_v23 }
 0x2f3   :  { %617 = vpow2.f32 %v379_v25 }
 0x2fd   :  { %v618_v26 = vpop.eup %617 }
 0x2fe   :  { %v364_v27 = vadd.f32 1.0, %v618_v26 }
 0x300   :  { %619 = vrcp.f32 %v364_v27 }
 0x30a   :  { %v620_v28 = vpop.eup %619 }
 0x30b   :  { %368 = vst.msk [vmem:[%s870_s7] sm:$0xff] %vm367_vm1, %v620_v28 }
 0x30c   :  { %373 = vsyncpa [#allocation3], 1 }
 0x30d   :  { %374 = vsyncpa [#allocation5], 1 }
 0x30e   :  { %375 = vsyncpa [#allocation8], 1 }

</bundles_post_ra>
